<compile_context>
chip_gen: v7x
topology: tpu7x:2x2x1
jax: 0.10.0
libtpu: 0.0.40
codegen_flags: <defaults>
</compile_context>

<pallas_src>
import jax
import jax.numpy as jnp
from jax.experimental import pallas as pl
from jax.experimental.pallas import tpu as pltpu


def _base_model_kernel(x_ref, pw_ref, w1_ref, b1_ref, w2_ref, b2_ref, o_ref):
    # x_ref:  (TB*T, D)   this batch tile, time flattened into rows (bf16/f32)
    # pw_ref: (TB*T, 1)   f32 pooling weights = valid/denom per (row, t)
    # w1_ref: (D, H)      pre_net weight  (bf16/f32), b1_ref: (1, H) f32
    # w2_ref: (H, O_pad)  post_net weight (bf16/f32), b2_ref: (1, O_pad) f32
    # o_ref:  (TB, O_pad) f32
    tb, _ = o_ref.shape
    rows, h_dim = x_ref.shape[0], w1_ref.shape[1]
    t = rows // tb

    # pre_net + ReLU, with the masked-mean weight fused into the epilogue
    # (single pass over h; no extra store/load and no pooling matmul).
    h = jnp.dot(x_ref[...], w1_ref[...], preferred_element_type=jnp.float32)
    h = jnp.maximum(h + b1_ref[...], 0.0) * pw_ref[...]          # (TB*T, H) f32

    # masked mean over time: grouped reduction over T consecutive rows per
    # batch item (T=8 maps exactly onto one sublane group -> XLU reduce).
    pooled = h.reshape(tb, t, h_dim).sum(axis=1)                 # (TB, H) f32

    # post_net (bf16 MXU, f32 accumulate), lane-dense store.
    out = jnp.dot(pooled.astype(w2_ref.dtype), w2_ref[...],
                  preferred_element_type=jnp.float32)
    o_ref[...] = (out + b2_ref[...]).astype(o_ref.dtype)         # (TB, O_pad)


def base_model_forward(x, padding_mask, w1, b1, w2, b2, *,
                       rows_per_step=2048, compute_dtype=jnp.bfloat16):
    """x: (B, T, D) f32, padding_mask: (B, T) f32 (1 = pad). Returns (B, O) f32."""
    B, T, D = x.shape
    H = w1.shape[1]
    O = w2.shape[1]

    # ---- batch-tile selection: big M per step, but >= 2 tiles when B allows
    #      (keeps both TensorCores busy on v7x megacore).
    tb = max(1, rows_per_step // T)
    if tb >= B:
        if B >= 16:
            tb = max(8, ((((B + 1) // 2) + 7) // 8) * 8)   # ~half the batch, 8-aligned
            n_tiles = pl.cdiv(B, tb)
        else:
            tb, n_tiles = B, 1                             # tiny batch: single step
    else:
        tb = max(8, (tb // 8) * 8)                         # sublane (8) rule
        n_tiles = pl.cdiv(B, tb)
    B_pad = n_tiles * tb

    # ---- per-(row, t) pooling weights: valid/denom, exact reference semantics
    valid = 1.0 - padding_mask.astype(jnp.float32)               # (B, T)
    denom = valid.sum(axis=1, keepdims=True)                     # (B, 1)
    # Guard fully-padded rows (denom == 0) against NaN; valid counts >= 1 are
    # unchanged, so normal rows match the reference exactly.
    denom = jnp.maximum(denom, 1.0)
    wts = (valid / denom).astype(jnp.float32)                    # (B, T)

    if B_pad != B:
        x = jnp.pad(x, ((0, B_pad - B), (0, 0), (0, 0)))
        wts = jnp.pad(wts, ((0, B_pad - B), (0, 0)))             # pad rows -> weight 0
    wts_flat = wts.reshape(B_pad * T, 1)                         # f32, stays f32

    # ---- lane-dense output: pad O up to a multiple of 128
    O_pad = ((O + 127) // 128) * 128
    w1c = w1.astype(compute_dtype)
    w2p = jnp.pad(w2, ((0, 0), (0, O_pad - O))).astype(compute_dtype)
    b1_2d = b1.reshape(1, H).astype(jnp.float32)
    b2p = jnp.pad(b2.reshape(1, O), ((0, 0), (0, O_pad - O))).astype(jnp.float32)

    x2 = x.reshape(B_pad * T, D).astype(compute_dtype)           # flatten time into rows

    itemsize = jnp.dtype(compute_dtype).itemsize
    flops = 2 * B_pad * T * D * H + 2 * B_pad * T * H + 2 * B_pad * H * O_pad
    bytes_accessed = (B_pad * T * D * itemsize            # x
                      + B_pad * T * 4                     # pooling weights
                      + (D * H + H * O_pad) * itemsize    # W1, W2
                      + (H + O_pad) * 4                   # biases
                      + B_pad * O_pad * 4)                # output

    out = pl.pallas_call(
        _base_model_kernel,
        out_shape=jax.ShapeDtypeStruct((B_pad, O_pad), jnp.float32),
        grid_spec=pltpu.PrefetchScalarGridSpec(
            num_scalar_prefetch=0,
            grid=(n_tiles,),
            in_specs=[
                pl.BlockSpec((tb * T, D), lambda i: (i, 0)),          # x rows
                pl.BlockSpec((tb * T, 1), lambda i: (i, 0)),          # pooling weights
                pl.BlockSpec((D, H), lambda i: (0, 0)),               # W1 (resident)
                pl.BlockSpec((1, H), lambda i: (0, 0)),               # b1
                pl.BlockSpec((H, O_pad), lambda i: (0, 0)),           # W2 (padded)
                pl.BlockSpec((1, O_pad), lambda i: (0, 0)),           # b2 (padded)
            ],
            out_specs=pl.BlockSpec((tb, O_pad), lambda i: (i, 0)),
        ),
        compiler_params=pltpu.CompilerParams(
            dimension_semantics=("parallel",),                        # megacore-friendly
            vmem_limit_bytes=32 * 1024 * 1024),
        cost_estimate=pl.CostEstimate(flops=flops, transcendentals=0,
                                      bytes_accessed=bytes_accessed),
    )(x2, wts_flat, w1c, b1_2d, w2p, b2p)

    return out[:B, :O]


def _reference_forward(x, padding_mask, w1, b1, w2, b2):
    h = jnp.maximum(x @ w1 + b1, 0.0)
    valid = 1.0 - padding_mask.astype(jnp.float32)
    h = h * valid[..., None]
    pooled = h.sum(axis=1) / valid.sum(axis=1, keepdims=True)
    return pooled @ w2 + b2


if __name__ == "__main__":
    # Small shapes consistent with the module: BaseModel(input_dim=32, output_dim=4)
    B, T, D, H, O = 2, 8, 32, 256, 4

    key = jax.random.PRNGKey(0)
    kx, kw1, kb1, kw2, kb2 = jax.random.split(key, 5)

    x = jax.random.normal(kx, (B, T, D), dtype=jnp.float32)

    # padding_mask: 1 = padded, 0 = valid (as in the PyTorch forward)
    lengths = jnp.array([6, 4], dtype=jnp.int32)
    padding_mask = (jnp.arange(T)[None, :] >= lengths[:, None]).astype(jnp.float32)

    # Deterministic init, PyTorch nn.Linear style: U(-1/sqrt(fan_in), 1/sqrt(fan_in)).
    lim1 = 1.0 / jnp.sqrt(jnp.float32(D))
    lim2 = 1.0 / jnp.sqrt(jnp.float32(H))
    w1 = jax.random.uniform(kw1, (D, H), jnp.float32, -lim1, lim1)
    b1 = jax.random.uniform(kb1, (H,), jnp.float32, -lim1, lim1)
    w2 = jax.random.uniform(kw2, (H, O), jnp.float32, -lim2, lim2)
    b2 = jax.random.uniform(kb2, (O,), jnp.float32, -lim2, lim2)

    ref = _reference_forward(x, padding_mask, w1, b1, w2, b2)

    # --- f32 path: exact structural check against the reference (tight tol)
    out_f32 = base_model_forward(x, padding_mask, w1, b1, w2, b2,
                                 compute_dtype=jnp.float32)
    out_f32 = jax.block_until_ready(out_f32)
    assert out_f32.shape == (B, O)
    assert jnp.allclose(out_f32, ref, atol=1e-5, rtol=1e-5), (out_f32, ref)

    # --- bf16 MXU path (default): f32 accumulation, loose tolerance
    out_bf16 = base_model_forward(x, padding_mask, w1, b1, w2, b2)
    out_bf16 = jax.block_until_ready(out_bf16)
    assert out_bf16.shape == (B, O)
    assert jnp.allclose(out_bf16, ref, atol=2e-2, rtol=2e-2), (out_bf16, ref)

    # --- multi-tile paths (batch padded/split across grid steps)
    B2 = 20
    kx2, km2 = jax.random.split(jax.random.PRNGKey(1))
    x_big = jax.random.normal(kx2, (B2, T, D), dtype=jnp.float32)
    lens_big = jax.random.randint(km2, (B2,), 1, T + 1)
    mask_big = (jnp.arange(T)[None, :] >= lens_big[:, None]).astype(jnp.float32)
    ref_big = _reference_forward(x_big, mask_big, w1, b1, w2, b2)

    # default rows_per_step: B=20 >= 16 -> split into 2 tiles of 16 (padded to 32)
    out_big = base_model_forward(x_big, mask_big, w1, b1, w2, b2,
                                 compute_dtype=jnp.float32)
    out_big = jax.block_until_ready(out_big)
    assert out_big.shape == (B2, O)
    assert jnp.allclose(out_big, ref_big, atol=1e-5, rtol=1e-5), (out_big, ref_big)

    # small rows_per_step: forces 3 grid steps of tb=8
    out_big16 = base_model_forward(x_big, mask_big, w1, b1, w2, b2,
                                   rows_per_step=64)
    out_big16 = jax.block_until_ready(out_big16)
    assert out_big16.shape == (B2, O)
    assert jnp.allclose(out_big16, ref_big, atol=2e-2, rtol=2e-2), (out_big16, ref_big)

    print("KERNEL_OK")
</pallas_src>

<mosaic_0001>
module attributes {stable_mosaic.version = 11 : i64} {
  func.func @_base_model_kernel(%arg0: i32, %arg1: memref<16x32xf32, #tpu.memory_space<vmem>>, %arg2: memref<16x1xf32, #tpu.memory_space<vmem>>, %arg3: memref<32x256xf32, #tpu.memory_space<vmem>>, %arg4: memref<1x256xf32, #tpu.memory_space<vmem>>, %arg5: memref<256x128xf32, #tpu.memory_space<vmem>>, %arg6: memref<1x128xf32, #tpu.memory_space<vmem>>, %arg7: memref<2x128xf32, #tpu.memory_space<vmem>>) attributes {dimension_semantics = [#tpu.dimension_semantics<parallel>], iteration_bounds = array<i64: 1>, scalar_prefetch = 0 : i64, scratch_operands = 0 : i64, tpu.core_type = #tpu.core_type<tc>, window_params = [{transform_indices = @transform_0, window_bounds = array<i64: 16, 32>}, {transform_indices = @transform_1, window_bounds = array<i64: 16, 1>}, {pipeline_mode = #tpu.pipeline_mode<synchronous>, transform_indices = @transform_2, window_bounds = array<i64: 32, 256>}, {pipeline_mode = #tpu.pipeline_mode<synchronous>, transform_indices = @transform_3, window_bounds = array<i64: 1, 256>}, {pipeline_mode = #tpu.pipeline_mode<synchronous>, transform_indices = @transform_4, window_bounds = array<i64: 256, 128>}, {pipeline_mode = #tpu.pipeline_mode<synchronous>, transform_indices = @transform_5, window_bounds = array<i64: 1, 128>}, {transform_indices = @transform_6, window_bounds = array<i64: 2, 128>}]} {
    %c0 = arith.constant 0 : index
    %c0_0 = arith.constant 0 : index
    %0 = vector.load %arg1[%c0, %c0_0] : memref<16x32xf32, #tpu.memory_space<vmem>>, vector<16x32xf32>
    %c0_1 = arith.constant 0 : index
    %c0_2 = arith.constant 0 : index
    %1 = vector.load %arg3[%c0_1, %c0_2] : memref<32x256xf32, #tpu.memory_space<vmem>>, vector<32x256xf32>
    %cst = arith.constant dense<0.000000e+00> : vector<16x256xf32>
    %2 = tpu.matmul %0, %1, %cst {dimension_numbers = #tpu.dot_dimension_numbers<[1], [0], [0], [1], [0, 0, 1, 1], [], []>} : vector<16x32xf32>, vector<32x256xf32>, vector<16x256xf32> -> vector<16x256xf32>
    %c0_3 = arith.constant 0 : index
    %c0_4 = arith.constant 0 : index
    %3 = vector.load %arg4[%c0_3, %c0_4] : memref<1x256xf32, #tpu.memory_space<vmem>>, vector<1x256xf32>
    %4 = vector.broadcast %3 : vector<1x256xf32> to vector<16x256xf32>
    %5 = arith.addf %2, %4 : vector<16x256xf32>
    %cst_5 = arith.constant 0.000000e+00 : f32
    %6 = vector.broadcast %cst_5 : f32 to vector<16x256xf32>
    %7 = arith.maximumf %5, %6 : vector<16x256xf32>
    %c0_6 = arith.constant 0 : index
    %c0_7 = arith.constant 0 : index
    %8 = vector.load %arg2[%c0_6, %c0_7] : memref<16x1xf32, #tpu.memory_space<vmem>>, vector<16x1xf32>
    %9 = vector.broadcast %8 : vector<16x1xf32> to vector<16x256xf32>
    %10 = arith.mulf %7, %9 : vector<16x256xf32>
    %11 = vector.shape_cast %10 : vector<16x256xf32> to vector<2x8x256xf32>
    %cst_8 = arith.constant dense<0.000000e+00> : vector<2x256xf32>
    %12 = vector.multi_reduction <add>, %11, %cst_8 [1] : vector<2x8x256xf32> to vector<2x256xf32>
    %c0_9 = arith.constant 0 : index
    %c0_10 = arith.constant 0 : index
    %13 = vector.load %arg5[%c0_9, %c0_10] : memref<256x128xf32, #tpu.memory_space<vmem>>, vector<256x128xf32>
    %cst_11 = arith.constant dense<0.000000e+00> : vector<2x128xf32>
    %14 = tpu.matmul %12, %13, %cst_11 {dimension_numbers = #tpu.dot_dimension_numbers<[1], [0], [0], [1], [0, 0, 1, 1], [], []>} : vector<2x256xf32>, vector<256x128xf32>, vector<2x128xf32> -> vector<2x128xf32>
    %c0_12 = arith.constant 0 : index
    %c0_13 = arith.constant 0 : index
    %15 = vector.load %arg6[%c0_12, %c0_13] : memref<1x128xf32, #tpu.memory_space<vmem>>, vector<1x128xf32>
    %16 = vector.broadcast %15 : vector<1x128xf32> to vector<2x128xf32>
    %17 = arith.addf %14, %16 : vector<2x128xf32>
    %c0_14 = arith.constant 0 : index
    %c0_15 = arith.constant 0 : index
    %18 = vector.load %arg7[%c0_14, %c0_15] : memref<2x128xf32, #tpu.memory_space<vmem>>, vector<2x128xf32>
    tpu.vector_store %arg7[%c0_14, %c0_15], %17 {strides = array<i32>} : memref<2x128xf32, #tpu.memory_space<vmem>>, vector<2x128xf32>,
    return
  }
  func.func @transform_0(%arg0: i32) -> (i32, i32) {
    %c0_i32 = arith.constant 0 : i32
    %c0_i32_0 = arith.constant 0 : i32
    return %arg0, %c0_i32 : i32, i32
  }
  func.func @transform_1(%arg0: i32) -> (i32, i32) {
    %c0_i32 = arith.constant 0 : i32
    %c0_i32_0 = arith.constant 0 : i32
    return %arg0, %c0_i32 : i32, i32
  }
  func.func @transform_2(%arg0: i32) -> (i32, i32) {
    %c0_i32 = arith.constant 0 : i32
    %c0_i32_0 = arith.constant 0 : i32
    %c0_i32_1 = arith.constant 0 : i32
    return %c0_i32, %c0_i32_0 : i32, i32
  }
  func.func @transform_3(%arg0: i32) -> (i32, i32) {
    %c0_i32 = arith.constant 0 : i32
    %c0_i32_0 = arith.constant 0 : i32
    %c0_i32_1 = arith.constant 0 : i32
    return %c0_i32, %c0_i32_0 : i32, i32
  }
  func.func @transform_4(%arg0: i32) -> (i32, i32) {
    %c0_i32 = arith.constant 0 : i32
    %c0_i32_0 = arith.constant 0 : i32
    %c0_i32_1 = arith.constant 0 : i32
    return %c0_i32, %c0_i32_0 : i32, i32
  }
  func.func @transform_5(%arg0: i32) -> (i32, i32) {
    %c0_i32 = arith.constant 0 : i32
    %c0_i32_0 = arith.constant 0 : i32
    %c0_i32_1 = arith.constant 0 : i32
    return %c0_i32, %c0_i32_0 : i32, i32
  }
  func.func @transform_6(%arg0: i32) -> (i32, i32) {
    %c0_i32 = arith.constant 0 : i32
    %c0_i32_0 = arith.constant 0 : i32
    return %arg0, %c0_i32 : i32, i32
  }
}

</mosaic_0001>

<bundles_post_ra>
// kernel: tpu_custom_call.1
= control target key start
LH: loop header
LB: loop body
LE: loop exit
PB: predicated region body
PF: predicated region fallthrough
CT: control target
= control target key end

     0   :  { %11 = vsyncpa [#allocation3], 0  ;;  %s595_s0 = inlined_call_operand.vmem [shape: f32[16,32], index: 0, kind: input, shape index: {}]   ;;  %s596_s1 = inlined_call_operand.vmem [shape: f32[16,1], index: 1, kind: input, shape index: {}]   ;;  %s597_s2 = inlined_call_operand.hbm [shape: f32[32,256], index: 2, kind: input, shape index: {}]   ;;  %s598_s3 = inlined_call_operand.vmem [shape: f32[1,256], index: 3, kind: input, shape index: {}]   ;;  %s599_s4 = inlined_call_operand.hbm [shape: f32[256,128], index: 4, kind: input, shape index: {}]   ;;  %s600_s5 = inlined_call_operand.vmem [shape: f32[1,128], index: 5, kind: input, shape index: {}]   ;;  %s601_s6 = inlined_call_operand.hbm [shape: f32[2,128], index: 6, kind: output, shape index: {}]  }
   0x1   :  { %12 = vsyncpa [#allocation6], 0 }
   0x2   :  { %13 = vsyncpa [#allocation4], 0  ;;  %s497_s21 = smov [#allocation2]   ;;  %s425_s25 = scalar_lea.hbm %s597_s2, 1024 }
   0x3   :  { %s23_s22 = sshll.u32 %s497_s21, 4  ;;  %p426_p0 = scmp.ne.s32.totalorder %s597_s2, %s425_s25  ;;  %s24_s22 = int_to_ptr.vmem [resolvable:$true] %s23_s22 }
   0x4   :  { %p429_p1 = scmp.lt.u32.totalorder %s425_s25, %s597_s2 }
   0x6   :  { %p431_p2 = pnand %p429_p1, %p426_p0 }
   0x8   :  { %434 = shalt.err (!%p431_p2)
}
   0x9   :  { %s435_s30 = scalar_lea.vmem %s24_s22, 1024  ;;  %p440_p4 = scmp.lt.s32.totalorder %s24_s22, %s24_s22 }
   0xa   :  { %p436_p3 = scmp.ne.s32.totalorder %s24_s22, %s435_s30  ;;  %p441_p5 = scmp.lt.s32.totalorder %s435_s30, %s435_s30 }
   0xc   :  { %p442_p6 = por %p441_p5, %p440_p4 }
   0xe   :  { %p443_p7 = pnand %p442_p6, %p436_p3 }
  0x10   :  { %446 = shalt.err (!%p443_p7)
}
  0x11   :  { %s498_s7 = smov 256   ;;  %s499_s8 = smov 16  }
  0x12   :  { %29 = dma.hbm_to_vmem [thread:$0]  %s597_s2, 1024, %s24_s22, [#allocation3], %s498_s7, %s498_s7, %s499_s8  }
  0x13   :  { %s500_s11 = smov [#allocation5]   ;;  %s447_s15 = scalar_lea.hbm %s599_s4, 4096 }
  0x14   :  { %s37_s12 = sshll.u32 %s500_s11, 4  ;;  %p448_p8 = scmp.ne.s32.totalorder %s599_s4, %s447_s15  ;;  %s38_s12 = int_to_ptr.vmem [resolvable:$true] %s37_s12 }
  0x15   :  { %p451_p9 = scmp.lt.u32.totalorder %s447_s15, %s599_s4 }
  0x17   :  { %p453_p10 = pnand %p451_p9, %p448_p8 }
  0x19   :  { %456 = shalt.err (!%p453_p10)
}
  0x1a   :  { %s457_s20 = scalar_lea.vmem %s38_s12, 4096  ;;  %p462_p12 = scmp.lt.s32.totalorder %s38_s12, %s38_s12 }
  0x1b   :  { %p458_p11 = scmp.ne.s32.totalorder %s38_s12, %s457_s20  ;;  %p463_p13 = scmp.lt.s32.totalorder %s457_s20, %s457_s20 }
  0x1d   :  { %p464_p0 = por %p463_p13, %p462_p12 }
  0x1f   :  { %p465_p1 = pnand %p464_p0, %p458_p11 }
  0x21   :  { %468 = shalt.err (!%p465_p1)
}
  0x22   :  { %s501_s2 = smov 128   ;;  %s502_s21 = smov 8  }
  0x23   :  { %43 = dma.hbm_to_vmem [thread:$0]  %s599_s4, 4096, %s38_s12, [#allocation6], %s501_s2, %s501_s2, %s502_s21  }
  0x24   :  { %491 = dma.done.wait [#allocation3], 1024  }
  0x25   :  { %492 = vsyncadd [#allocation3], 4294966272 }
  0x26   :  { %493 = dma.done.wait [#allocation6], 4096  }
  0x27   :  { %494 = vsyncadd [#allocation6], 4294963200  ;;  %v503_v0 = vmov 0.0   ;;  %v504_v1 = vmov 0   ;;  %v55_v2 = vld [vmem:[#allocation2 + $0x8] sm:$0xff]  ;;  %v57_v3 = vld [vmem:[#allocation2 + $0x18] sm:$0xff] }
  0x28   :  { %145 = vmatprep.mubr.f32.mxu0 %v503_v0  ;;  %424 = vset.pattern.permute.xlu0 %v504_v1  ;;  %v54_v4 = vld [vmem:[#allocation2] sm:$0xff]  ;;  %v375_v5 = vpack.c.bf16 %v57_v3, %v55_v2  ;;  %v56_v6 = vld [vmem:[#allocation2 + $0x10] sm:$0xff]  ;;  %v59_v7 = vld [vmem:[#allocation2 + $0x28] sm:$0xff]  ;;  %vm74_vm0 = vcmask 261120   ;;  %v64_v2 = vlaneseq  ;;  %vm245_vm1 = vcmask 1041409   ;;  %s505_s8 = smov [#allocation7]  }
  0x29   :  { %v61_v8 = vld [vmem:[#allocation2 + $0x38] sm:$0xff]  ;;  %v377_v9 = vpack.c.bf16 %v56_v6, %v54_v4  ;;  %v58_v11 = vld [vmem:[#allocation2 + $0x20] sm:$0xff]  ;;  %v60_v12 = vld [vmem:[#allocation2 + $0x30] sm:$0xff]  ;;  %s327_s9 = sshll.u32 %s505_s8, 4  ;;  %s328_s9 = int_to_ptr.vmem [resolvable:$true] %s327_s9 }
  0x2a   :  { %v379_v10 = vpack.c.bf16 %v61_v8, %v59_v7  ;;  %376 = vmatprep.subr.bf16.mxu0 %v375_v5  ;;  %v162_v13 = vld [vmem:[%s596_s1] sm:$0xff]  ;;  %v163_v14 = vld [vmem:[%s596_s1 + $0x8] sm:$0xff]  ;;  %v381_v15 = vpack.c.bf16 %v60_v12, %v58_v11  ;;  %v220_v21 = vld [vmem:[#allocation5 + $0x90] sm:$0xff]  ;;  %v65_v3 = vshrl.u32 %v64_v2, 7  ;;  %s469_s10 = scalar_lea.vmem %s328_s9, 32  ;;  %p474_p3 = scmp.lt.s32.totalorder %s328_s9, %s328_s9 }
  0x2b   :  { %378 = vmatpush1.bf16.msra.mxu0 %v377_v9  ;;  %166 = vperm.xlu0 %424, %v162_v13   ;;  %v218_v16 = vld [vmem:[#allocation5 + $0x80] sm:$0xff]  ;;  %v219_v17 = vld [vmem:[#allocation5 + $0x88] sm:$0xff]  ;;  %v221_v22 = vld [vmem:[#allocation5 + $0x98] sm:$0xff]  ;;  %p470_p2 = scmp.ne.s32.totalorder %s328_s9, %s469_s10  ;;  %p475_p4 = scmp.lt.s32.totalorder %s469_s10, %s469_s10 }
  0x2c   :  { %v202_v18 = vld [vmem:[#allocation5] sm:$0xff]  ;;  %380 = vmatprep.subr.bf16.mxu0 %v379_v10  ;;  %v383_v19 = vpack.c.bf16 %v219_v17, %v218_v16  ;;  %v203_v20 = vld [vmem:[#allocation5 + $0x8] sm:$0xff]  ;;  %v387_v24 = vpack.c.bf16 %v221_v22, %v220_v21  ;;  %v204_v25 = vld [vmem:[#allocation5 + $0x10] sm:$0xff]  ;;  %v66_v4 = vsub.s32 0, %v65_v3  ;;  %v70_v6 = vsub.s32 1, %v65_v3 }
  0x2d   :  { %v385_v23 = vpack.c.bf16 %v203_v20, %v202_v18  ;;  %v205_v26 = vld [vmem:[#allocation5 + $0x18] sm:$0xff]  ;;  %v52_v27 = vld [vmem:[%s595_s0] sm:$0xff]  ;;  %v53_v29 = vld [vmem:[%s595_s0 + $0x8] sm:$0xff]  ;;  %p476_p5 = por %p475_p4, %p474_p3 }
  0x2e   :  { %384 = vmatprep.subr.bf16.mxu1 %v383_v19  ;;  %v389_v28 = vpack.c.bf16 %v205_v26, %v204_v25  ;;  %v222_v30 = vld [vmem:[#allocation5 + $0xa0] sm:$0xff]  ;;  %v223_v31 = vld [vmem:[#allocation5 + $0xa8] sm:$0xff]  ;;  %v224_v36 = vld [vmem:[#allocation5 + $0xb0] sm:$0xff] }
  0x2f   :  { %382 = vmatpush1.bf16.msra.mxu0 %v381_v15  ;;  %171 = vperm.xlu0 %424, %v163_v14   ;;  %v391_v32 = vpack.c.bf16 %v223_v31, %v222_v30  ;;  %v206_v33 = vld [vmem:[#allocation5 + $0x20] sm:$0xff]  ;;  %v207_v34 = vld [vmem:[#allocation5 + $0x28] sm:$0xff]  ;;  %v225_v37 = vld [vmem:[#allocation5 + $0xb8] sm:$0xff]  ;;  %p477_p6 = pnand %p476_p5, %p470_p2 }
  0x30   :  { %386 = vmatpush3.bf16.msra.mxu1 %v385_v23  ;;  %v393_v35 = vpack.c.bf16 %v207_v34, %v206_v33  ;;  %v395_v38 = vpack.c.bf16 %v225_v37, %v224_v36  ;;  %v208_v39 = vld [vmem:[#allocation5 + $0x30] sm:$0xff]  ;;  %v209_v40 = vld [vmem:[#allocation5 + $0x38] sm:$0xff]  ;;  %v226_v42 = vld [vmem:[#allocation5 + $0xc0] sm:$0xff] }
  0x31   :  { %388 = vmatprep.subr.bf16.mxu1 %v387_v24  ;;  %v397_v41 = vpack.c.bf16 %v209_v40, %v208_v39  ;;  %v227_v43 = vld [vmem:[#allocation5 + $0xc8] sm:$0xff]  ;;  %v210_v45 = vld [vmem:[#allocation5 + $0x40] sm:$0xff]  ;;  %v228_v48 = vld [vmem:[#allocation5 + $0xd0] sm:$0xff] }
  0x32   :  { %337 = vmatmul.mubr.msk.f32.vlgmr.msra.gmra.mrb[0].mxu0 %vm74_vm0, %v52_v27  ;;  %v399_v44 = vpack.c.bf16 %v227_v43, %v226_v42  ;;  %v211_v46 = vld [vmem:[#allocation5 + $0x48] sm:$0xff]  ;;  %v229_v49 = vld [vmem:[#allocation5 + $0xd8] sm:$0xff]  ;;  %v212_v51 = vld [vmem:[#allocation5 + $0x50] sm:$0xff] }
  0x33   :  { %151 = vmatprep.mubr.f32.mxu0 %v503_v0  ;;  %v401_v47 = vpack.c.bf16 %v211_v46, %v210_v45  ;;  %v403_v50 = vpack.c.bf16 %v229_v49, %v228_v48  ;;  %v213_v52 = vld [vmem:[#allocation5 + $0x58] sm:$0xff]  ;;  %v230_v54 = vld [vmem:[#allocation5 + $0xe0] sm:$0xff]  ;;  %v231_v55 = vld [vmem:[#allocation5 + $0xe8] sm:$0xff] }
  0x34   :  { %390 = vmatpush3.bf16.msra.mxu1 %v389_v28  ;;  %v405_v53 = vpack.c.bf16 %v213_v52, %v212_v51  ;;  %v407_v56 = vpack.c.bf16 %v231_v55, %v230_v54  ;;  %v214_v57 = vld [vmem:[#allocation5 + $0x60] sm:$0xff]  ;;  %v215_v58 = vld [vmem:[#allocation5 + $0x68] sm:$0xff]  ;;  %v232_v60 = vld [vmem:[#allocation5 + $0xf0] sm:$0xff] }
  0x35   :  { %392 = vmatprep.subr.bf16.mxu1 %v391_v32  ;;  %v409_v59 = vpack.c.bf16 %v215_v58, %v214_v57  ;;  %v233_v61 = vld [vmem:[#allocation5 + $0xf8] sm:$0xff]  ;;  %v216_v62 = vld [vmem:[#allocation5 + $0x70] sm:$0xff]  ;;  %v62_v5 = vld [vmem:[%s598_s3] sm:$0x3] }
  0x36   :  { %338 = vmatmul.mubr.msk.f32.gmra.mrb[2].mxu0 %vm74_vm0, %v53_v29  ;;  %v411_v63 = vpack.c.bf16 %v233_v61, %v232_v60  ;;  %v217_v0 = vld [vmem:[#allocation5 + $0x78] sm:$0xff]  ;;  %v67_v7 = vrot.slane %v62_v5, %v66_v4  ;;  %v71_v8 = vrot.slane %v62_v5, %v70_v6  ;;  %v339_v54 = vld [vmem:[%s600_s5] ss:$0 sm:$0xff] }
  0x37   :  { %v413_v1 = vpack.c.bf16 %v217_v0, %v216_v62 }
  0x38   :  { %394 = vmatpush3.bf16.msra.mxu1 %v393_v35 }
  0x39   :  { %396 = vmatprep.subr.bf16.mxu1 %v395_v38 }
  0x3c   :  { %398 = vmatpush3.bf16.msra.mxu1 %v397_v41 }
  0x3d   :  { %400 = vmatprep.subr.bf16.mxu1 %v399_v44 }
  0x40   :  { %402 = vmatpush3.bf16.msra.mxu1 %v401_v47 }
  0x41   :  { %404 = vmatprep.subr.bf16.mxu1 %v403_v50 }
  0x44   :  { %406 = vmatpush3.bf16.msra.mxu1 %v405_v53 }
  0x45   :  { %408 = vmatprep.subr.bf16.mxu1 %v407_v56 }
  0x48   :  { %410 = vmatpush3.bf16.msra.mxu1 %v409_v59 }
  0x49   :  { %412 = vmatprep.subr.bf16.mxu1 %v411_v63 }
  0x4c   :  { %414 = vmatpush3.bf16.msra.mxu1 %v413_v1 }
  0xaa   :  { %v167_v12 = vpop.permute.xlu0 %166 }
  0xae   :  { %v172_v25 = vpop.permute.xlu0 %171 }
 0x105   :  { %v147_v9 = vpop.f32.mrb[0].mxu0 }
 0x106   :  { %v148_v10 = vadd.f32 %v147_v9, %v67_v7  ;;  %v149_v11 = vpop.f32.mrb[1].mxu0 }
 0x107   :  { %v150_v13 = vadd.f32 %v149_v11, %v71_v8 }
 0x108   :  { %v158_v14 = vmax.f32 %v148_v10, 0.0 }
 0x109   :  { %v159_v15 = vmax.f32 %v150_v13, 0.0  ;;  %v153_v16 = vpop.f32.mrb[2].mxu0 }
 0x10a   :  { %v174_v17 = vmul.f32 %v167_v12, %v158_v14  ;;  %v154_v18 = vadd.f32 %v153_v16, %v67_v7  ;;  %v155_v19 = vpop.f32.mrb[3].mxu0 }
 0x10b   :  { %v175_v20 = vmul.f32 %v167_v12, %v159_v15  ;;  %v156_v21 = vadd.f32 %v155_v19, %v71_v8 }
 0x10c   :  { %v178_v22 = vrot.slane %v174_v17, 4  ;;  %v160_v23 = vmax.f32 %v154_v18, 0.0 }
 0x10d   :  { %v184_v24 = vrot.slane %v175_v20, 4  ;;  %v161_v26 = vmax.f32 %v156_v21, 0.0 }
 0x10e   :  { %v179_v27 = vadd.f32 %v178_v22, %v174_v17  ;;  %v176_v28 = vmul.f32 %v172_v25, %v160_v23 }
 0x10f   :  { %v185_v29 = vadd.f32 %v184_v24, %v175_v20  ;;  %v177_v30 = vmul.f32 %v172_v25, %v161_v26 }
 0x110   :  { %v180_v31 = vrot.slane %v179_v27, 2  ;;  %v190_v32 = vrot.slane %v176_v28, 4 }
 0x111   :  { %v186_v33 = vrot.slane %v185_v29, 2  ;;  %v196_v34 = vrot.slane %v177_v30, 4 }
 0x112   :  { %v181_v35 = vadd.f32 %v180_v31, %v179_v27  ;;  %v191_v36 = vadd.f32 %v190_v32, %v176_v28 }
 0x113   :  { %v197_v37 = vadd.f32 %v196_v34, %v177_v30  ;;  %v187_v38 = vadd.f32 %v186_v33, %v185_v29 }
 0x114   :  { %v192_v39 = vrot.slane %v191_v36, 2  ;;  %v182_v41 = vrot.slane %v181_v35, 1 }
 0x115   :  { %v198_v40 = vrot.slane %v197_v37, 2  ;;  %v188_v43 = vrot.slane %v187_v38, 1 }
 0x116   :  { %v193_v42 = vadd.f32 %v192_v39, %v191_v36  ;;  %v183_v47 = vadd.f32 %v182_v41, %v181_v35 }
 0x117   :  { %v199_v44 = vadd.f32 %v198_v40, %v197_v37  ;;  %v189_v49 = vadd.f32 %v188_v43, %v187_v38 }
 0x118   :  { %v194_v45 = vrot.slane %v193_v42, 1 }
 0x119   :  { %v200_v46 = vrot.slane %v199_v44, 1 }
 0x11a   :  { %v195_v48 = vadd.f32 %v194_v45, %v193_v42 }
 0x11b   :  { %v201_v50 = vadd.f32 %v200_v46, %v199_v44 }
 0x11c   :  { %v246_v51 = vsel %vm245_vm1, %v195_v48, %v183_v47 }
 0x11d   :  { %v247_v52 = vsel %vm245_vm1, %v201_v50, %v189_v49 }
 0x11e   :  { %314 = vmatprep.mubr.f32.mxu1 %v247_v52 }
 0x11f   :  { %315 = vmatmul.mubr.f32.vlgmr.msra.gmra.mrb[0].mxu1 %v246_v51 }
 0x1f2   :  { %v372_v53 = vpop.f32.mrb[0].mxu1 }
 0x1f3   :  { %v373_v55 = vpop.f32.mrb[1].mxu1 }
 0x1f4   :  { %v374_v56 = vadd.f32 %v373_v55, %v372_v53 }
 0x1f6   :  { %v317_v57 = vadd.f32 %v374_v56, %v339_v54 }
 0x1f8   :  { %320 = vst [vmem:[#allocation7] sm:$0x3] %v317_v57 }
 0x1f9   :  { %480 = shalt.err (!%p477_p6)
}
 0x1fa   :  { %s481_s13 = scalar_lea.hbm %s601_s6, 32 }
 0x1fb   :  { %p482_p7 = scmp.ne.s32.totalorder %s601_s6, %s481_s13  ;;  %p485_p8 = scmp.lt.u32.totalorder %s481_s13, %s601_s6 }
 0x1fd   :  { %p487_p9 = pnand %p485_p8, %p482_p7 }
 0x1ff   :  { %490 = shalt.err (!%p487_p9)
}
 0x200   :  { %330 = dma.vmem_to_hbm [thread:$0]  %s328_s9, 32, %s601_s6, [#allocation4]  }
 0x201   :  { %495 = dma.done.wait [#allocation4], 32  }
 0x202   :  { %496 = vsyncadd [#allocation4], 4294967264 }
 0x203   :  { %334 = vsyncpa [#allocation3], 1 }
 0x204   :  { %335 = vsyncpa [#allocation6], 1 }
 0x205   :  { %336 = vsyncpa [#allocation4], 1 }

</bundles_post_ra>
